<compile_context>
chip_gen: v5e
topology: v5e:2x2
jax: 0.10.0
libtpu: 0.0.40
codegen_flags: <defaults>
</compile_context>

<pallas_src>
import functools

import jax
import jax.numpy as jnp
from jax import lax
from jax.experimental import pallas as pl
from jax.experimental.pallas import tpu as pltpu


# ----------------------------------------------------------------------------
# Pallas kernels
# ----------------------------------------------------------------------------
def _ce_kernel(logits_ref, tgt_ref, out_ref, acc_ref, *, batch, tile_b, steps):
    """Tiled mean cross-entropy (sum of per-row NLL; wrapper divides by batch).

    grid = (split, steps); axis 0 is "parallel" (one output slab per core),
    axis 1 is the "arbitrary" reduction over row blocks.
    Per step: logits (tile_b, C) native dtype, tgt (tile_b, 1) int32.
    acc_ref: (tile_b, 1) f32 VMEM accumulator (VALU-only adds per step).
    """
    p = pl.program_id(0)
    i = pl.program_id(1)

    @pl.when(i == 0)
    def _():
        acc_ref[...] = jnp.zeros_like(acc_ref)

    logits = logits_ref[...].astype(jnp.float32)              # (tile_b, C)
    tb, c = logits.shape
    # numerically-stable log-sum-exp
    m = jnp.max(logits, axis=-1, keepdims=True)                # (tile_b, 1)
    lse = m + jnp.log(jnp.sum(jnp.exp(logits - m), axis=-1, keepdims=True))
    # gather target logit via masked select (no one-hot cast + multiply)
    col = lax.broadcasted_iota(jnp.int32, (tb, c), 1)
    tgt_logit = jnp.sum(jnp.where(col == tgt_ref[...], logits, 0.0),
                        axis=-1, keepdims=True)
    per_row = lse - tgt_logit                                  # (tile_b, 1)
    # mask ragged-boundary rows (block may over-cover the batch)
    block_idx = p * steps + i
    row = block_idx * tile_b + lax.broadcasted_iota(jnp.int32, (tb, 1), 0)
    per_row = jnp.where(row < batch, per_row, 0.0)
    acc_ref[...] += per_row

    @pl.when(i == pl.num_programs(1) - 1)
    def _():
        out_ref[...] = acc_ref[...].reshape(1, tb, 1)


def _mse_kernel(x_ref, y_ref, out_ref, acc_ref, *, rows, tile_rows, steps):
    """Tiled sum of squared error (wrapper divides by numel).

    Per step: x, y (tile_rows, lane) native dtype.
    acc_ref: (8, lane) f32 VMEM accumulator; the per-step reduce is a
    sublane-tile group sum (pure vreg adds), no cross-lane reduction.
    """
    p = pl.program_id(0)
    i = pl.program_id(1)

    @pl.when(i == 0)
    def _():
        acc_ref[...] = jnp.zeros_like(acc_ref)

    x = x_ref[...].astype(jnp.float32)
    y = y_ref[...].astype(jnp.float32)
    d = x - y
    lane = x.shape[-1]
    # mask ragged-boundary rows (block may over-cover the array)
    block_idx = p * steps + i
    r = block_idx * tile_rows + lax.broadcasted_iota(jnp.int32, (tile_rows, 1), 0)
    sq = jnp.where(r < rows, d * d, 0.0)
    acc_ref[...] += jnp.sum(sq.reshape(tile_rows // 8, 8, lane), axis=0)

    @pl.when(i == pl.num_programs(1) - 1)
    def _():
        out_ref[...] = acc_ref[...].reshape(1, 8, lane)


# ----------------------------------------------------------------------------
# Loss wrappers (pallas_call glue)
# ----------------------------------------------------------------------------
_VMEM_LIMIT = 32 * 1024 * 1024        # safe on v5e/v6e (128 MiB) and v7x (64 MiB)
_BLOCK_BYTES = 2 * 1024 * 1024        # ~2 MiB per input block (x2 inputs x2 buffers)


def cross_entropy_loss(input, target):
    """input: (B, C) float logits (native dtype); target: (B,) int class ids."""
    b, c = input.shape
    tgt = target.astype(jnp.int32).reshape(b, 1)
    itemsize = input.dtype.itemsize

    # tile_b from C: ~2 MiB of logits per block, multiple of 8 rows, floor 8.
    # TODO(synk): for extremely large C (huge vocab) an online-logsumexp over a
    # C-tiled grid would bound block bytes further; not needed for classifier heads.
    cap = max(8, min(1024, ((_BLOCK_BYTES // (c * itemsize)) // 8) * 8))
    tile_b = b if b <= cap else cap

    nblocks = -(-b // tile_b)
    split = 2 if nblocks >= 2 else 1        # 2-way TC sharding on v7x, neutral elsewhere
    steps = -(-nblocks // split)

    if split * steps == nblocks:
        in_map = lambda p, i: (p * steps + i, 0)
    else:
        # odd block count: clamp the one over-covering block (masked in-kernel)
        in_map = lambda p, i: (jnp.minimum(p * steps + i, nblocks - 1), 0)

    kernel = functools.partial(_ce_kernel, batch=b, tile_b=tile_b, steps=steps)
    partials = pl.pallas_call(
        kernel,
        out_shape=jax.ShapeDtypeStruct((split, tile_b, 1), jnp.float32),
        grid_spec=pltpu.PrefetchScalarGridSpec(
            num_scalar_prefetch=0,
            grid=(split, steps),
            in_specs=[
                pl.BlockSpec((tile_b, c), in_map),
                pl.BlockSpec((tile_b, 1), in_map),
            ],
            out_specs=pl.BlockSpec((1, tile_b, 1), lambda p, i: (p, 0, 0)),
            scratch_shapes=[pltpu.VMEM((tile_b, 1), jnp.float32)],
        ),
        compiler_params=pltpu.CompilerParams(
            dimension_semantics=("parallel", "arbitrary"),
            vmem_limit_bytes=_VMEM_LIMIT),
    )(input, tgt)
    return jnp.sum(partials) * jnp.float32(1.0 / b)


def mse_loss(input, target):
    """input/target: same-shape float arrays (e.g. NCHW maps). Scalar mean."""
    assert input.shape == target.shape
    n = 1
    for s in input.shape:
        n *= int(s)
    itemsize = input.dtype.itemsize

    # lane width: widest of {512,256,128} that divides numel (avoids tail pad)
    lane = 128
    for cand in (512, 256, 128):
        if n % cand == 0:
            lane = cand
            break
    rows = -(-n // lane)

    # block sizing: ~2 MiB per input block, rows multiple of 8
    cap = max(8, min(4096, ((_BLOCK_BYTES // (lane * itemsize)) // 8) * 8))
    if rows <= cap:
        rows_arr = ((rows + 7) // 8) * 8      # single block, rounded to 8 rows
        tile_rows = rows_arr
    else:
        rows_arr = rows
        tile_rows = cap

    x = input.reshape(-1)
    y = target.reshape(-1)
    n_arr = rows_arr * lane
    if n_arr != n:
        # TODO(synk): tail pad copies the tensor when numel % lane != 0 (or for
        # tiny maps); zero padding contributes 0 to the squared-error sum.
        x = jnp.pad(x, (0, n_arr - n))
        y = jnp.pad(y, (0, n_arr - n))
    x2 = x.reshape(rows_arr, lane)            # lane-dense layout, native dtype
    y2 = y.reshape(rows_arr, lane)

    nblocks = -(-rows_arr // tile_rows)
    split = 2 if nblocks >= 2 else 1
    steps = -(-nblocks // split)

    if split * steps == nblocks:
        in_map = lambda p, i: (p * steps + i, 0)
    else:
        in_map = lambda p, i: (jnp.minimum(p * steps + i, nblocks - 1), 0)

    kernel = functools.partial(_mse_kernel, rows=rows_arr, tile_rows=tile_rows,
                               steps=steps)
    partials = pl.pallas_call(
        kernel,
        out_shape=jax.ShapeDtypeStruct((split, 8, lane), jnp.float32),
        grid_spec=pltpu.PrefetchScalarGridSpec(
            num_scalar_prefetch=0,
            grid=(split, steps),
            in_specs=[
                pl.BlockSpec((tile_rows, lane), in_map),
                pl.BlockSpec((tile_rows, lane), in_map),
            ],
            out_specs=pl.BlockSpec((1, 8, lane), lambda p, i: (p, 0, 0)),
            scratch_shapes=[pltpu.VMEM((8, lane), jnp.float32)],
        ),
        compiler_params=pltpu.CompilerParams(
            dimension_semantics=("parallel", "arbitrary"),
            vmem_limit_bytes=_VMEM_LIMIT),
    )(x2, y2)
    return jnp.sum(partials) * jnp.float32(1.0 / n)


# ----------------------------------------------------------------------------
# JointLoss (mirrors the PyTorch container semantics)
# ----------------------------------------------------------------------------
LOSSES = {
    "CrossEntropyLoss": cross_entropy_loss,
    "MSELoss": mse_loss,
}


class JointLoss:
    def __init__(self, loss_list, loss_weights=None):
        # loss_list: list of (name, target_fields) tuples
        self.losses = []
        for name, target_fields in loss_list:
            if target_fields is None:
                raise AttributeError("`target_fields` must be specified in loss parameters")
            fn = LOSSES[name]
            self.losses.append((fn, target_fields, name))
        if loss_weights is None:
            self.weights = [1.0] * len(self.losses)
        else:
            if len(self.losses) != len(loss_weights):
                raise ValueError("Length of weights must be equal to the number of losses or be None")
            weights_sum = sum(loss_weights) / len(self.losses)
            self.weights = [w / weights_sum for w in loss_weights]

    @staticmethod
    def map_arguments(target_fields, kwargs):
        targeted_kwargs = {}
        for target_arg, source_arg in target_fields.items():
            if source_arg in kwargs:
                targeted_kwargs[target_arg] = kwargs[source_arg]
        return targeted_kwargs

    def __call__(self, **kwargs):
        # TODO(synk): log_separate_losses / task_module.log (Lightning logging)
        # has no kernel equivalent and is omitted.
        total_loss = 0.0
        active_loss = False
        for i, (loss_fn, target_fields, _name) in enumerate(self.losses):
            targeted_kwargs = self.map_arguments(target_fields, kwargs)
            if targeted_kwargs:
                loss = loss_fn(**targeted_kwargs)
                active_loss = True
            else:
                loss = 0.0
            total_loss = total_loss + loss * self.weights[i]
        if not active_loss:
            raise RuntimeError("Expected arguments to pass in at least one loss in loss list")
        return total_loss


# ----------------------------------------------------------------------------
# Demo / smoke test
# ----------------------------------------------------------------------------
if __name__ == "__main__":
    loss_list = [
        ("CrossEntropyLoss", {"input": "prediction", "target": "target"}),
        ("MSELoss", {"input": "pred_map", "target": "target_map"}),
    ]
    joint = JointLoss(loss_list, loss_weights=[0.7, 0.3])

    key = jax.random.PRNGKey(0)
    k1, k2, k3, k4 = jax.random.split(key, 4)

    B, C = 8, 32                    # classification head
    Bm, Cm, H, W = 2, 4, 16, 16     # dense map head (NCHW)

    logits = jax.random.normal(k1, (B, C), dtype=jnp.float32)
    labels = jax.random.randint(k2, (B,), 0, C, dtype=jnp.int32)
    pred_map = jax.random.normal(k3, (Bm, Cm, H, W), dtype=jnp.float32)
    target_map = jax.random.normal(k4, (Bm, Cm, H, W), dtype=jnp.float32)

    total = joint(
        prediction=logits,
        target=labels,
        pred_map=pred_map,
        target_map=target_map,
    )
    total = jax.block_until_ready(total)

    # Cross-check against plain-JAX reference.
    logp = jax.nn.log_softmax(logits, axis=-1)
    ce_ref = -jnp.mean(logp[jnp.arange(B), labels])
    mse_ref = jnp.mean((pred_map - target_map) ** 2)
    w = [0.7 / ((0.7 + 0.3) / 2), 0.3 / ((0.7 + 0.3) / 2)]
    ref = w[0] * ce_ref + w[1] * mse_ref
    assert jnp.allclose(total, ref, atol=1e-4, rtol=1e-4), (total, ref)

    print("KERNEL_OK")
</pallas_src>

<mosaic_0001>
module attributes {stable_mosaic.version = 11 : i64} {
  func.func @_ce_kernel(%arg0: i32, %arg1: i32, %arg2: memref<8x32xf32, #tpu.memory_space<vmem>>, %arg3: memref<8x1xi32, #tpu.memory_space<vmem>>, %arg4: memref<1x8x1xf32, #tpu.memory_space<vmem>>, %arg5: memref<8x1xf32, #tpu.memory_space<vmem>>) attributes {dimension_semantics = [#tpu.dimension_semantics<parallel>, #tpu.dimension_semantics<arbitrary>], iteration_bounds = array<i64: 1, 1>, scalar_prefetch = 0 : i64, scratch_operands = 1 : i64, tpu.core_type = #tpu.core_type<tc>, window_params = [{transform_indices = @transform_0, window_bounds = array<i64: 8, 32>}, {transform_indices = @transform_1, window_bounds = array<i64: 8, 1>}, {transform_indices = @transform_2, window_bounds = array<i64: 1, 8, 1>}]} {
    %c0_i32 = arith.constant 0 : i32
    %0 = arith.cmpi eq, %arg1, %c0_i32 : i32
    %1 = arith.extui %0 : i1 to i32
    %c0_i32_0 = arith.constant 0 : i32
    %2 = arith.cmpi ne, %1, %c0_i32_0 : i32
    scf.if %2 {
      %cst_15 = arith.constant 0.000000e+00 : f32
      %38 = vector.broadcast %cst_15 : f32 to vector<8x1xf32>
      %c0_16 = arith.constant 0 : index
      %c0_17 = arith.constant 0 : index
      %39 = vector.load %arg5[%c0_16, %c0_17] : memref<8x1xf32, #tpu.memory_space<vmem>>, vector<8x1xf32>
      tpu.vector_store %arg5[%c0_16, %c0_17], %38 {strides = array<i32>} : memref<8x1xf32, #tpu.memory_space<vmem>>, vector<8x1xf32>,
    } else {
    }
    %c0 = arith.constant 0 : index
    %c0_1 = arith.constant 0 : index
    %3 = vector.load %arg2[%c0, %c0_1] : memref<8x32xf32, #tpu.memory_space<vmem>>, vector<8x32xf32>
    %cst = arith.constant dense<0xFF800000> : vector<8xf32>
    %4 = vector.multi_reduction <maximumf>, %3, %cst [1] : vector<8x32xf32> to vector<8xf32>
    %5 = vector.shape_cast %4 : vector<8xf32> to vector<8x1xf32>
    %6 = vector.broadcast %5 : vector<8x1xf32> to vector<8x32xf32>
    %7 = arith.subf %3, %6 : vector<8x32xf32>
    %8 = math.exp %7 : vector<8x32xf32>
    %cst_2 = arith.constant dense<0.000000e+00> : vector<8xf32>
    %9 = vector.multi_reduction <add>, %8, %cst_2 [1] : vector<8x32xf32> to vector<8xf32>
    %10 = vector.shape_cast %9 : vector<8xf32> to vector<8x1xf32>
    %11 = math.log %10 : vector<8x1xf32>
    %12 = arith.addf %5, %11 : vector<8x1xf32>
    %13 = tpu.iota {dimensions = array<i32: 1>} : vector<8x32xi32>
    %c0_3 = arith.constant 0 : index
    %c0_4 = arith.constant 0 : index
    %14 = vector.load %arg3[%c0_3, %c0_4] : memref<8x1xi32, #tpu.memory_space<vmem>>, vector<8x1xi32>
    %15 = vector.broadcast %14 : vector<8x1xi32> to vector<8x32xi32>
    %16 = arith.cmpi eq, %13, %15 : vector<8x32xi32>
    %cst_5 = arith.constant 0.000000e+00 : f32
    %17 = vector.broadcast %cst_5 : f32 to vector<8x32xf32>
    %18 = arith.select %16, %3, %17 : vector<8x32xi1>, vector<8x32xf32>
    %cst_6 = arith.constant dense<0.000000e+00> : vector<8xf32>
    %19 = vector.multi_reduction <add>, %18, %cst_6 [1] : vector<8x32xf32> to vector<8xf32>
    %20 = vector.shape_cast %19 : vector<8xf32> to vector<8x1xf32>
    %21 = arith.subf %12, %20 : vector<8x1xf32>
    %c1_i32 = arith.constant 1 : i32
    %22 = arith.muli %arg0, %c1_i32 : i32
    %23 = arith.addi %22, %arg1 : i32
    %c8_i32 = arith.constant 8 : i32
    %24 = arith.muli %23, %c8_i32 : i32
    %25 = tpu.iota {dimensions = array<i32: 0>} : vector<8x1xi32>
    %26 = vector.broadcast %24 : i32 to vector<8x1xi32>
    %27 = arith.addi %26, %25 : vector<8x1xi32>
    %c8_i32_7 = arith.constant 8 : i32
    %28 = vector.broadcast %c8_i32_7 : i32 to vector<8x1xi32>
    %29 = arith.cmpi slt, %27, %28 : vector<8x1xi32>
    %cst_8 = arith.constant 0.000000e+00 : f32
    %30 = vector.broadcast %cst_8 : f32 to vector<8x1xf32>
    %31 = arith.select %29, %21, %30 : vector<8x1xi1>, vector<8x1xf32>
    %c0_9 = arith.constant 0 : index
    %c0_10 = arith.constant 0 : index
    %32 = vector.load %arg5[%c0_9, %c0_10] : memref<8x1xf32, #tpu.memory_space<vmem>>, vector<8x1xf32>
    %33 = arith.addf %32, %31 : vector<8x1xf32>
    %c0_11 = arith.constant 0 : index
    %c0_12 = arith.constant 0 : index
    %34 = vector.load %arg5[%c0_11, %c0_12] : memref<8x1xf32, #tpu.memory_space<vmem>>, vector<8x1xf32>
    tpu.vector_store %arg5[%c0_11, %c0_12], %33 {strides = array<i32>} : memref<8x1xf32, #tpu.memory_space<vmem>>, vector<8x1xf32>,
    %c0_i32_13 = arith.constant 0 : i32
    %35 = arith.cmpi eq, %arg1, %c0_i32_13 : i32
    %36 = arith.extui %35 : i1 to i32
    %c0_i32_14 = arith.constant 0 : i32
    %37 = arith.cmpi ne, %36, %c0_i32_14 : i32
    scf.if %37 {
      %c0_15 = arith.constant 0 : index
      %c0_16 = arith.constant 0 : index
      %38 = vector.load %arg5[%c0_15, %c0_16] : memref<8x1xf32, #tpu.memory_space<vmem>>, vector<8x1xf32>
      %39 = vector.shape_cast %38 : vector<8x1xf32> to vector<1x8x1xf32>
      %c0_17 = arith.constant 0 : index
      %c0_18 = arith.constant 0 : index
      %c0_19 = arith.constant 0 : index
      %40 = vector.load %arg4[%c0_17, %c0_18, %c0_19] : memref<1x8x1xf32, #tpu.memory_space<vmem>>, vector<1x8x1xf32>
      tpu.vector_store %arg4[%c0_17, %c0_18, %c0_19], %39 {strides = array<i32>} : memref<1x8x1xf32, #tpu.memory_space<vmem>>, vector<1x8x1xf32>,
    } else {
    }
    return
  }
  func.func @transform_0(%arg0: i32, %arg1: i32) -> (i32, i32) {
    %c1_i32 = arith.constant 1 : i32
    %0 = arith.muli %arg0, %c1_i32 : i32
    %1 = arith.addi %0, %arg1 : i32
    %c0_i32 = arith.constant 0 : i32
    %c0_i32_0 = arith.constant 0 : i32
    return %1, %c0_i32 : i32, i32
  }
  func.func @transform_1(%arg0: i32, %arg1: i32) -> (i32, i32) {
    %c1_i32 = arith.constant 1 : i32
    %0 = arith.muli %arg0, %c1_i32 : i32
    %1 = arith.addi %0, %arg1 : i32
    %c0_i32 = arith.constant 0 : i32
    %c0_i32_0 = arith.constant 0 : i32
    return %1, %c0_i32 : i32, i32
  }
  func.func @transform_2(%arg0: i32, %arg1: i32) -> (i32, i32, i32) {
    %c0_i32 = arith.constant 0 : i32
    %c0_i32_0 = arith.constant 0 : i32
    %c0_i32_1 = arith.constant 0 : i32
    return %arg0, %c0_i32, %c0_i32_0 : i32, i32, i32
  }
}

</mosaic_0001>

<bundles_post_ra>
// kernel: tpu_custom_call.1
= control target key start
LH: loop header
LB: loop body
LE: loop exit
PB: predicated region body
PF: predicated region fallthrough
CT: control target
= control target key end

     0   :  { %vm52_vm0 = vcmask 261120   ;;  %v117_v1 = vmov 0   ;;  %v65_v9 = vlaneseq  ;;  %vm49_vm2 = vcmask 7168   ;;  %s146_s0 = inlined_call_operand.vmem [shape: f32[8,32], index: 0, kind: input, shape index: {}]   ;;  %s147_s1 = inlined_call_operand.vmem [shape: s32[8,1], index: 1, kind: input, shape index: {}]   ;;  %s148_s2 = inlined_call_operand.vmem [shape: f32[1,8,1], index: 2, kind: output, shape index: {}]  }
   0x1   :  { %v51_v0 = vld [vmem:[%s146_s0] sm:$0xff]  ;;  %112 = vset.pattern.permute.xlu0 %v117_v1  ;;  %v118_v14 = vmov 0.0  }
   0x2   :  { %v53_v2 = vsel %vm52_vm0, %v51_v0, -inf  ;;  %v67_v3 = vld [vmem:[%s147_s1] sm:$0xff]  ;;  %v66_v10 = vand.u32 127, %v65_v9  ;;  %50 = vst.msk [vmem:[#allocation2] sm:$0xff] %vm49_vm2, %v118_v14 }
   0x3   :  { %54 = vmax.xlane.f32.xlu0 %v53_v2 }
   0x9   :  { %v85_v20 = vld [vmem:[#allocation2] sm:$0xff] }
  0x17   :  { %69 = vperm.xlu0 %112, %v67_v3  }
  0x76   :  { %v55_v4 = vpop.xlane.xlu0 %54 }
  0x77   :  { %v56_v5 = vsub.f32 %v51_v0, %v55_v4 }
  0x79   :  { %v57_v6 = vmul.f32 1.442695, %v56_v5 }
  0x7b   :  { %113 = vpow2.f32 %v57_v6 }
  0x81   :  { %v114_v7 = vpop.eup %113 }
  0x82   :  { %v59_v8 = vsel %vm52_vm0, %v114_v7, 0.0 }
  0x83   :  { %60 = vadd.xlane.f32.xlu1 %v59_v8 }
  0x89   :  { %v70_v11 = vpop.permute.xlu0 %69 }
  0x8a   :  { %vm71_vm1 = vcmp.eq.s32.totalorder %v66_v10, %v70_v11 }
  0x8b   :  { %v72_v12 = vsel %vm71_vm1, %v51_v0, 0.0 }
  0x8c   :  { %v73_v13 = vsel %vm52_vm0, %v72_v12, 0.0 }
  0x8d   :  { %74 = vadd.xlane.f32.xlu1 %v73_v13 }
  0xf6   :  { %v61_v15 = vpop.xlane.xlu1 %60 }
  0xf7   :  { %115 = vlog2.f32 %v61_v15 }
  0xfd   :  { %v116_v16 = vpop.eup %115 }
  0xfe   :  { %v63_v17 = vmul.f32 0.6931472, %v116_v16 }
 0x100   :  { %v64_v18 = vadd.f32 %v63_v17, %v55_v4  ;;  %v75_v19 = vpop.xlane.xlu1 %74 }
 0x102   :  { %v76_v21 = vsub.f32 %v64_v18, %v75_v19 }
 0x104   :  { %v86_v22 = vadd.f32 %v85_v20, %v76_v21 }
 0x106   :  { %88 = vst.msk [vmem:[#allocation2] sm:$0xff] %vm49_vm2, %v86_v22 }
 0x10d   :  { %v92_v23 = vld [vmem:[#allocation2] sm:$0xff] }
 0x10e   :  { %93 = vst.msk [vmem:[%s148_s2] sm:$0xff] %vm49_vm2, %v92_v23 }

</bundles_post_ra>
